<compile_context>
chip_gen: v5e
topology: v5e:2x2
jax: 0.10.0
libtpu: 0.0.40
codegen_flags: <defaults>
</compile_context>

<pallas_src>
import functools

import numpy as np
import jax
import jax.numpy as jnp
from jax.experimental import pallas as pl
from jax.experimental.pallas import tpu as pltpu

LN_EPS = 1e-5  # nn.LayerNorm default


# ----------------------------------------------------------------------------
# kernel
# ----------------------------------------------------------------------------
def _ln2d_kernel(x_ref, g_ref, b_ref, o_ref, *, eps):
    # x_ref/o_ref: (TB, C, TS)   g_ref/b_ref: (C, 1)
    x = x_ref[...].astype(jnp.float32)                     # (TB, C, TS)
    inv_c = 1.0 / x.shape[1]
    # fused single-pass statistics: one sweep over x for both sums
    s1 = jnp.sum(x, axis=1, keepdims=True)                 # (TB, 1, TS)
    s2 = jnp.sum(x * x, axis=1, keepdims=True)             # (TB, 1, TS)
    mean = s1 * inv_c
    var = jnp.maximum(s2 * inv_c - mean * mean, 0.0)
    inv_std = jax.lax.rsqrt(var + eps)                     # EUP slot
    xn = (x - mean) * inv_std                              # (TB, C, TS)
    # (C, 1) broadcasts as (1, C, 1) against (TB, C, TS)
    o_ref[...] = (xn * g_ref[...] + b_ref[...]).astype(o_ref.dtype)


# ----------------------------------------------------------------------------
# tile selection
# ----------------------------------------------------------------------------
def _choose_tiles(B, C, S, budget_elems=1 << 19):
    # ~2 MiB f32 per block -> ~8 MiB double-buffered in+out; fits v5e/v6e/v7x easily
    # while keeping per-block DMAs large enough to hit the HBM roofline.
    if C * S <= budget_elems:
        # whole spatial row fits: pack batch elements to amortize per-step overhead
        tb = min(B, max(1, budget_elems // (C * S)))
        while tb > 1 and B % tb != 0:                      # prefer no padded edge blocks
            tb -= 1
        return tb, S
    # otherwise tile the lane axis in 128-multiples
    ts = max(128, (budget_elems // max(C, 1)) // 128 * 128)
    while ts > 128 and S % ts != 0:                        # prefer no padded edge blocks
        ts -= 128
    return 1, ts


# ----------------------------------------------------------------------------
# wrapper
# ----------------------------------------------------------------------------
@functools.partial(jax.jit, static_argnames=("eps", "batch_tile", "spatial_tile"))
def layer_norm_2d(x, gamma, beta, *, eps=LN_EPS, batch_tile=None, spatial_tile=None):
    B, C, H, W = x.shape
    S = H * W
    xf = x.reshape(B, C, S)                                # contiguous -> free reshape

    tb_auto, ts_auto = _choose_tiles(B, C, S)
    tb = tb_auto if batch_tile is None else batch_tile
    ts = ts_auto if spatial_tile is None else spatial_tile
    tb = max(1, min(tb, B))
    ts = min(ts, S)
    if ts < S:                                             # keep lane-dense / aligned
        ts = max(128, (ts // 128) * 128)

    out = pl.pallas_call(
        functools.partial(_ln2d_kernel, eps=eps),
        out_shape=jax.ShapeDtypeStruct((B, C, S), x.dtype),
        grid=(pl.cdiv(B, tb), pl.cdiv(S, ts)),
        in_specs=[
            pl.BlockSpec((tb, C, ts), lambda b, s: (b, 0, s)),
            pl.BlockSpec((C, 1), lambda b, s: (0, 0)),     # gamma resident in VMEM
            pl.BlockSpec((C, 1), lambda b, s: (0, 0)),     # beta  resident in VMEM
        ],
        out_specs=pl.BlockSpec((tb, C, ts), lambda b, s: (b, 0, s)),
        compiler_params=pltpu.CompilerParams(
            dimension_semantics=("parallel", "parallel")),
    )(xf, gamma.reshape(C, 1), beta.reshape(C, 1))
    return out.reshape(B, C, H, W)


# ----------------------------------------------------------------------------
# pure-JAX reference (mirrors the PyTorch module exactly)
# ----------------------------------------------------------------------------
def layer_norm_2d_reference(x, gamma, beta, eps=LN_EPS):
    xt = x.transpose(0, 2, 3, 1).astype(jnp.float32)       # NCHW -> NHWC
    m = xt.mean(-1, keepdims=True)
    v = ((xt - m) ** 2).mean(-1, keepdims=True)
    y = (xt - m) / jnp.sqrt(v + eps) * gamma + beta
    return y.transpose(0, 3, 1, 2).astype(x.dtype)         # NHWC -> NCHW


# ----------------------------------------------------------------------------
if __name__ == "__main__":
    key = jax.random.PRNGKey(0)
    k0, k1, k2, k3, k4 = jax.random.split(key, 5)

    # --- test 1: module-sized toy shape (embed_dim=32, 16x16 map, batch 2) ----------
    B, C, H, W = 2, 32, 16, 16
    x = jax.random.normal(k0, (B, C, H, W), jnp.float32)
    gamma = 1.0 + 0.1 * jax.random.normal(k1, (C,), jnp.float32)
    beta = 0.1 * jax.random.normal(k2, (C,), jnp.float32)

    y = layer_norm_2d(x, gamma, beta)
    jax.block_until_ready(y)
    y_ref = layer_norm_2d_reference(x, gamma, beta)
    np.testing.assert_allclose(np.asarray(y), np.asarray(y_ref), rtol=1e-5, atol=1e-5)
    assert y.shape == (B, C, H, W) and y.dtype == x.dtype

    # --- test 2: force spatial tiling (grid > 1 on the lane axis, TB = 1) -----------
    B2, C2, H2, W2 = 2, 16, 16, 24        # S = 384 -> three 128-wide lane tiles
    x2 = jax.random.normal(k3, (B2, C2, H2, W2), jnp.float32)
    g2 = jnp.linspace(0.5, 1.5, C2, dtype=jnp.float32)
    b2 = jnp.linspace(-0.2, 0.2, C2, dtype=jnp.float32)
    y2 = layer_norm_2d(x2, g2, b2, batch_tile=1, spatial_tile=128)
    jax.block_until_ready(y2)
    y2_ref = layer_norm_2d_reference(x2, g2, b2)
    np.testing.assert_allclose(np.asarray(y2), np.asarray(y2_ref), rtol=1e-5, atol=1e-5)

    # --- test 3: batch packing (TB > 1) with a non-128-multiple spatial extent ------
    B3, C3, H3, W3 = 3, 48, 18, 18        # S = 324, whole row per block, TB = 3
    x3 = jax.random.normal(k4, (B3, C3, H3, W3), jnp.float32)
    g3 = jnp.linspace(0.8, 1.2, C3, dtype=jnp.float32)
    b3 = jnp.linspace(-0.1, 0.1, C3, dtype=jnp.float32)
    y3 = layer_norm_2d(x3, g3, b3)
    jax.block_until_ready(y3)
    y3_ref = layer_norm_2d_reference(x3, g3, b3)
    np.testing.assert_allclose(np.asarray(y3), np.asarray(y3_ref), rtol=1e-5, atol=1e-5)

    print("KERNEL_OK")
</pallas_src>

<mosaic_0001>
module attributes {stable_mosaic.version = 11 : i64} {
  func.func @_ln2d_kernel(%arg0: i32, %arg1: i32, %arg2: memref<2x32x256xf32, #tpu.memory_space<vmem>>, %arg3: memref<32x1xf32, #tpu.memory_space<vmem>>, %arg4: memref<32x1xf32, #tpu.memory_space<vmem>>, %arg5: memref<2x32x256xf32, #tpu.memory_space<vmem>>) attributes {dimension_semantics = [#tpu.dimension_semantics<parallel>, #tpu.dimension_semantics<parallel>], iteration_bounds = array<i64: 1, 1>, scalar_prefetch = 0 : i64, scratch_operands = 0 : i64, tpu.core_type = #tpu.core_type<tc>, window_params = [{transform_indices = @transform_0, window_bounds = array<i64: 2, 32, 256>}, {pipeline_mode = #tpu.pipeline_mode<synchronous>, transform_indices = @transform_1, window_bounds = array<i64: 32, 1>}, {pipeline_mode = #tpu.pipeline_mode<synchronous>, transform_indices = @transform_2, window_bounds = array<i64: 32, 1>}, {transform_indices = @transform_3, window_bounds = array<i64: 2, 32, 256>}]} {
    %c0 = arith.constant 0 : index
    %c0_0 = arith.constant 0 : index
    %c0_1 = arith.constant 0 : index
    %0 = vector.load %arg2[%c0, %c0_0, %c0_1] : memref<2x32x256xf32, #tpu.memory_space<vmem>>, vector<2x32x256xf32>
    %cst = arith.constant dense<0.000000e+00> : vector<2x256xf32>
    %1 = vector.multi_reduction <add>, %0, %cst [1] : vector<2x32x256xf32> to vector<2x256xf32>
    %2 = vector.shape_cast %1 : vector<2x256xf32> to vector<2x1x256xf32>
    %3 = arith.mulf %0, %0 : vector<2x32x256xf32>
    %cst_2 = arith.constant dense<0.000000e+00> : vector<2x256xf32>
    %4 = vector.multi_reduction <add>, %3, %cst_2 [1] : vector<2x32x256xf32> to vector<2x256xf32>
    %5 = vector.shape_cast %4 : vector<2x256xf32> to vector<2x1x256xf32>
    %cst_3 = arith.constant 3.125000e-02 : f32
    %6 = vector.broadcast %cst_3 : f32 to vector<2x1x256xf32>
    %7 = arith.mulf %2, %6 : vector<2x1x256xf32>
    %cst_4 = arith.constant 3.125000e-02 : f32
    %8 = vector.broadcast %cst_4 : f32 to vector<2x1x256xf32>
    %9 = arith.mulf %5, %8 : vector<2x1x256xf32>
    %10 = arith.mulf %7, %7 : vector<2x1x256xf32>
    %11 = arith.subf %9, %10 : vector<2x1x256xf32>
    %cst_5 = arith.constant 0.000000e+00 : f32
    %12 = vector.broadcast %cst_5 : f32 to vector<2x1x256xf32>
    %13 = arith.maximumf %11, %12 : vector<2x1x256xf32>
    %cst_6 = arith.constant 9.99999974E-6 : f32
    %14 = vector.broadcast %cst_6 : f32 to vector<2x1x256xf32>
    %15 = arith.addf %13, %14 : vector<2x1x256xf32>
    %16 = math.rsqrt %15 : vector<2x1x256xf32>
    %17 = vector.broadcast %7 : vector<2x1x256xf32> to vector<2x32x256xf32>
    %18 = arith.subf %0, %17 : vector<2x32x256xf32>
    %19 = vector.broadcast %16 : vector<2x1x256xf32> to vector<2x32x256xf32>
    %20 = arith.mulf %18, %19 : vector<2x32x256xf32>
    %c0_7 = arith.constant 0 : index
    %c0_8 = arith.constant 0 : index
    %21 = vector.load %arg3[%c0_7, %c0_8] : memref<32x1xf32, #tpu.memory_space<vmem>>, vector<32x1xf32>
    %22 = vector.shape_cast %21 : vector<32x1xf32> to vector<1x32x1xf32>
    %23 = vector.broadcast %22 : vector<1x32x1xf32> to vector<2x32x256xf32>
    %24 = arith.mulf %20, %23 : vector<2x32x256xf32>
    %c0_9 = arith.constant 0 : index
    %c0_10 = arith.constant 0 : index
    %25 = vector.load %arg4[%c0_9, %c0_10] : memref<32x1xf32, #tpu.memory_space<vmem>>, vector<32x1xf32>
    %26 = vector.shape_cast %25 : vector<32x1xf32> to vector<1x32x1xf32>
    %27 = vector.broadcast %26 : vector<1x32x1xf32> to vector<2x32x256xf32>
    %28 = arith.addf %24, %27 : vector<2x32x256xf32>
    %c0_11 = arith.constant 0 : index
    %c0_12 = arith.constant 0 : index
    %c0_13 = arith.constant 0 : index
    %29 = vector.load %arg5[%c0_11, %c0_12, %c0_13] : memref<2x32x256xf32, #tpu.memory_space<vmem>>, vector<2x32x256xf32>
    tpu.vector_store %arg5[%c0_11, %c0_12, %c0_13], %28 {strides = array<i32>} : memref<2x32x256xf32, #tpu.memory_space<vmem>>, vector<2x32x256xf32>,
    return
  }
  func.func @transform_0(%arg0: i32, %arg1: i32) -> (i32, i32, i32) {
    %c0_i32 = arith.constant 0 : i32
    %c0_i32_0 = arith.constant 0 : i32
    return %arg0, %c0_i32, %arg1 : i32, i32, i32
  }
  func.func @transform_1(%arg0: i32, %arg1: i32) -> (i32, i32) {
    %c0_i32 = arith.constant 0 : i32
    %c0_i32_0 = arith.constant 0 : i32
    %c0_i32_1 = arith.constant 0 : i32
    return %c0_i32, %c0_i32_0 : i32, i32
  }
  func.func @transform_2(%arg0: i32, %arg1: i32) -> (i32, i32) {
    %c0_i32 = arith.constant 0 : i32
    %c0_i32_0 = arith.constant 0 : i32
    %c0_i32_1 = arith.constant 0 : i32
    return %c0_i32, %c0_i32_0 : i32, i32
  }
  func.func @transform_3(%arg0: i32, %arg1: i32) -> (i32, i32, i32) {
    %c0_i32 = arith.constant 0 : i32
    %c0_i32_0 = arith.constant 0 : i32
    return %arg0, %c0_i32, %arg1 : i32, i32, i32
  }
}

</mosaic_0001>

<bundles_post_ra>
// kernel: layer_norm_2d.1
= control target key start
LH: loop header
LB: loop body
LE: loop exit
PB: predicated region body
PF: predicated region fallthrough
CT: control target
= control target key end

     0   :  { %v326_v0 = vmov 0   ;;  %s607_s1 = inlined_call_operand.vmem [shape: f32[32,1], index: 1, kind: input, shape index: {}]   ;;  %s608_s2 = inlined_call_operand.vmem [shape: f32[32,1], index: 2, kind: input, shape index: {}]   ;;  %s609_s0 = inlined_call_operand.vmem [shape: f32[2,32,256], index: 0, kind: input, shape index: {}]   ;;  %s610_s3 = inlined_call_operand.vmem [shape: f32[2,32,256], index: 3, kind: output, shape index: {}]  }
   0x1   :  { %316 = vset.pattern.permute.xlu1 %v326_v0  ;;  %315 = vset.pattern.permute.xlu0 %v326_v0  ;;  %v216_v1 = vld [vmem:[%s607_s1 + $0x10] sm:$0xff]  ;;  %v214_v2 = vld [vmem:[%s607_s1] sm:$0xff]  ;;  %v217_v4 = vld [vmem:[%s607_s1 + $0x18] sm:$0xff] }
   0x2   :  { %230 = vperm.xlu1 %316, %v216_v1   ;;  %220 = vperm.xlu0 %315, %v214_v2   ;;  %v254_v3 = vld [vmem:[%s608_s2] sm:$0xff]  ;;  %v215_v5 = vld [vmem:[%s607_s1 + $0x8] sm:$0xff]  ;;  %v257_v7 = vld [vmem:[%s608_s2 + $0x18] sm:$0xff] }
   0x3   :  { %317 = vset.pattern.permute.xlu2 %v326_v0  ;;  %v255_v6 = vld [vmem:[%s608_s2 + $0x8] sm:$0xff]  ;;  %v256_v8 = vld [vmem:[%s608_s2 + $0x10] sm:$0xff]  ;;  %v374_v9 = vld [vmem:[%s609_s0] sm:$0xff] }
   0x4   :  { %260 = vperm.xlu2 %317, %v254_v3   ;;  %v379_v10 = vld [vmem:[%s609_s0 + $0x8] sm:$0xff]  ;;  %v384_v11 = vld [vmem:[%s609_s0 + $0x10] sm:$0xff]  ;;  %v389_v12 = vld [vmem:[%s609_s0 + $0x18] sm:$0xff]  ;;  %v66_v16 = vmul.f32 %v374_v9, %v374_v9 }
   0x5   :  { %v394_v13 = vld [vmem:[%s609_s0 + $0x40] sm:$0xff]  ;;  %v399_v14 = vld [vmem:[%s609_s0 + $0x48] sm:$0xff]  ;;  %v30_v15 = vadd.f32 %v384_v11, %v374_v9  ;;  %v67_v17 = vmul.f32 %v379_v10, %v379_v10  ;;  %v68_v18 = vmul.f32 %v384_v11, %v384_v11  ;;  %v422_v21 = vld [vmem:[%s609_s0 + $0x50] sm:$0xff]  ;;  %v39_v22 = vadd.f32 %v389_v12, %v379_v10 }
   0x6   :  { %v412_v19 = vld [vmem:[%s609_s0 + $0x20] sm:$0xff]  ;;  %v417_v20 = vld [vmem:[%s609_s0 + $0x28] sm:$0xff]  ;;  %v69_v23 = vmul.f32 %v389_v12, %v389_v12  ;;  %v74_v24 = vmul.f32 %v394_v13, %v394_v13  ;;  %v75_v25 = vmul.f32 %v399_v14, %v399_v14  ;;  %v435_v26 = vld [vmem:[%s609_s0 + $0x58] sm:$0xff]  ;;  %v48_v30 = vadd.f32 %v422_v21, %v394_v13 }
   0x7   :  { %v440_v27 = vld [vmem:[%s609_s0 + $0x60] sm:$0xff]  ;;  %v445_v28 = vld [vmem:[%s609_s0 + $0x68] sm:$0xff]  ;;  %v31_v29 = vadd.f32 %v30_v15, %v412_v19  ;;  %v70_v31 = vmul.f32 %v412_v19, %v412_v19  ;;  %v71_v32 = vmul.f32 %v417_v20, %v417_v20  ;;  %v457_v33 = vld [vmem:[%s609_s0 + $0x30] sm:$0xff]  ;;  %v40_v36 = vadd.f32 %v39_v22, %v417_v20 }
   0x8   :  { %v462_v34 = vld [vmem:[%s609_s0 + $0x38] sm:$0xff]  ;;  %v467_v35 = vld [vmem:[%s609_s0 + $0x70] sm:$0xff]  ;;  %v57_v37 = vadd.f32 %v435_v26, %v399_v14  ;;  %v76_v38 = vmul.f32 %v422_v21, %v422_v21  ;;  %v77_v39 = vmul.f32 %v435_v26, %v435_v26  ;;  %v49_v42 = vadd.f32 %v48_v30, %v440_v27 }
   0x9   :  { %v479_v40 = vld [vmem:[%s609_s0 + $0x78] sm:$0xff]  ;;  %v32_v41 = vadd.f32 %v31_v29, %v457_v33  ;;  %v72_v43 = vmul.f32 %v457_v33, %v457_v33  ;;  %v73_v44 = vmul.f32 %v462_v34, %v462_v34  ;;  %v41_v45 = vadd.f32 %v40_v36, %v462_v34 }
   0xa   :  { %235 = vperm.xlu1 %316, %v217_v4   ;;  %225 = vperm.xlu0 %315, %v215_v5   ;;  %v58_v46 = vadd.f32 %v57_v37, %v445_v28  ;;  %v78_v47 = vmul.f32 %v440_v27, %v440_v27  ;;  %v79_v48 = vmul.f32 %v445_v28, %v445_v28 }
   0xb   :  { %v33_v49 = vrot.slane %v32_v41, 4  ;;  %v50_v50 = vadd.f32 %v49_v42, %v467_v35  ;;  %v80_v51 = vmul.f32 %v467_v35, %v467_v35  ;;  %v81_v52 = vmul.f32 %v479_v40, %v479_v40 }
   0xc   :  { %265 = vperm.xlu2 %317, %v255_v6   ;;  %v42_v53 = vrot.slane %v41_v45, 4  ;;  %v59_v54 = vadd.f32 %v58_v46, %v479_v40  ;;  %v82_v55 = vadd.f32 %v68_v18, %v66_v16  ;;  %v91_v56 = vadd.f32 %v69_v23, %v67_v17 }
   0xd   :  { %v34_v57 = vadd.f32 %v33_v49, %v32_v41  ;;  %v51_v58 = vrot.slane %v50_v50, 4  ;;  %v100_v59 = vadd.f32 %v76_v38, %v74_v24  ;;  %v109_v60 = vadd.f32 %v77_v39, %v75_v25 }
   0xe   :  { %v43_v61 = vadd.f32 %v42_v53, %v41_v45  ;;  %v60_v62 = vrot.slane %v59_v54, 4  ;;  %v83_v63 = vadd.f32 %v82_v55, %v70_v31  ;;  %v92_v0 = vadd.f32 %v91_v56, %v71_v32 }
   0xf   :  { %v35_v1 = vrot.slane %v34_v57, 2  ;;  %v52_v2 = vadd.f32 %v51_v58, %v50_v50  ;;  %v101_v3 = vadd.f32 %v100_v59, %v78_v47  ;;  %v110_v4 = vadd.f32 %v109_v60, %v79_v48 }
  0x10   :  { %v44_v5 = vrot.slane %v43_v61, 2  ;;  %v61_v6 = vadd.f32 %v60_v62, %v59_v54 }
  0x11   :  { %v36_v15 = vadd.f32 %v35_v1, %v34_v57  ;;  %v53_v22 = vrot.slane %v52_v2, 2  ;;  %v102_v16 = vadd.f32 %v101_v3, %v80_v51  ;;  %v111_v17 = vadd.f32 %v110_v4, %v81_v52 }
  0x12   :  { %275 = vperm.xlu1 %316, %v257_v7   ;;  %270 = vperm.xlu0 %315, %v256_v8   ;;  %v84_v7 = vadd.f32 %v83_v63, %v72_v43  ;;  %v93_v8 = vadd.f32 %v92_v0, %v73_v44  ;;  %v45_v18 = vadd.f32 %v44_v5, %v43_v61  ;;  %v62_v23 = vrot.slane %v61_v6, 2 }
  0x13   :  { %v37_v29 = vrot.slane %v36_v15, 1  ;;  %v54_v30 = vadd.f32 %v53_v22, %v52_v2  ;;  %v103_v31 = vrot.slane %v102_v16, 4  ;;  %v112_v32 = vrot.slane %v111_v17, 4 }
  0x14   :  { %v85_v24 = vrot.slane %v84_v7, 4  ;;  %v94_v25 = vrot.slane %v93_v8, 4  ;;  %v46_v36 = vrot.slane %v45_v18, 1  ;;  %v63_v37 = vadd.f32 %v62_v23, %v61_v6 }
  0x15   :  { %v55_v41 = vrot.slane %v54_v30, 1  ;;  %v104_v42 = vadd.f32 %v103_v31, %v102_v16  ;;  %v113_v43 = vadd.f32 %v112_v32, %v111_v17  ;;  %v38_v44 = vadd.f32 %v37_v29, %v36_v15 }
  0x16   :  { %v86_v38 = vadd.f32 %v85_v24, %v84_v7  ;;  %v95_v39 = vadd.f32 %v94_v25, %v93_v8  ;;  %v64_v45 = vrot.slane %v63_v37, 1  ;;  %v47_v48 = vadd.f32 %v46_v36, %v45_v18 }
  0x17   :  { %v105_v49 = vrot.slane %v104_v42, 2  ;;  %v114_v50 = vrot.slane %v113_v43, 2  ;;  %v56_v51 = vadd.f32 %v55_v41, %v54_v30  ;;  %v499_v59 = vmul.f32 0.03125, %v38_v44 }
  0x18   :  { %v87_v46 = vrot.slane %v86_v38, 2  ;;  %v96_v47 = vrot.slane %v95_v39, 2  ;;  %v65_v54 = vadd.f32 %v64_v45, %v63_v37  ;;  %v501_v62 = vmul.f32 0.03125, %v47_v48 }
  0x19   :  { %v106_v55 = vadd.f32 %v105_v49, %v104_v42  ;;  %v115_v56 = vadd.f32 %v114_v50, %v113_v43  ;;  %v503_v1 = vmul.f32 0.03125, %v56_v51  ;;  %v126_v6 = vmul.f32 %v499_v59, %v499_v59 }
  0x1a   :  { %v88_v52 = vadd.f32 %v87_v46, %v86_v38  ;;  %v97_v53 = vadd.f32 %v96_v47, %v95_v39  ;;  %v505_v4 = vmul.f32 0.03125, %v65_v54  ;;  %v127_v8 = vmul.f32 %v501_v62, %v501_v62 }
  0x1b   :  { %v107_v60 = vrot.slane %v106_v55, 1  ;;  %v116_v61 = vrot.slane %v115_v56, 1  ;;  %v128_v22 = vmul.f32 %v503_v1, %v503_v1 }
  0x1c   :  { %v89_v57 = vrot.slane %v88_v52, 1  ;;  %v98_v58 = vrot.slane %v97_v53, 1  ;;  %v129_v17 = vmul.f32 %v505_v4, %v505_v4 }
  0x1d   :  { %v108_v2 = vadd.f32 %v107_v60, %v106_v55  ;;  %v117_v3 = vadd.f32 %v116_v61, %v115_v56 }
  0x1e   :  { %v90_v63 = vadd.f32 %v89_v57, %v88_v52  ;;  %v99_v0 = vadd.f32 %v98_v58, %v97_v53 }
  0x1f   :  { %v124_v15 = vmul.f32 0.03125, %v108_v2  ;;  %v125_v16 = vmul.f32 0.03125, %v117_v3 }
  0x20   :  { %v122_v5 = vmul.f32 0.03125, %v90_v63  ;;  %v123_v7 = vmul.f32 0.03125, %v99_v0 }
  0x21   :  { %v132_v24 = vsub.f32 %v124_v15, %v128_v22  ;;  %v133_v25 = vsub.f32 %v125_v16, %v129_v17 }
  0x22   :  { %v130_v18 = vsub.f32 %v122_v5, %v126_v6  ;;  %v131_v23 = vsub.f32 %v123_v7, %v127_v8  ;;  %v182_v5 = vsub.f32 %v374_v9, %v499_v59  ;;  %v183_v6 = vsub.f32 %v379_v10, %v501_v62 }
  0x23   :  { %v136_v31 = vmax.f32 %v132_v24, 0.0  ;;  %v137_v32 = vmax.f32 %v133_v25, 0.0  ;;  %v190_v7 = vsub.f32 %v394_v13, %v503_v1  ;;  %v191_v8 = vsub.f32 %v399_v14, %v505_v4 }
  0x24   :  { %v134_v29 = vmax.f32 %v130_v18, 0.0  ;;  %v135_v30 = vmax.f32 %v131_v23, 0.0  ;;  %v184_v13 = vsub.f32 %v384_v11, %v499_v59  ;;  %v185_v14 = vsub.f32 %v389_v12, %v501_v62 }
  0x25   :  { %v140_v38 = vadd.f32 1e-05, %v136_v31  ;;  %v141_v39 = vadd.f32 1e-05, %v137_v32  ;;  %v193_v31 = vsub.f32 %v435_v26, %v505_v4  ;;  %v188_v26 = vsub.f32 %v457_v33, %v499_v59 }
  0x26   :  { %v138_v36 = vadd.f32 1e-05, %v134_v29  ;;  %v139_v37 = vadd.f32 1e-05, %v135_v30  ;;  %v192_v30 = vsub.f32 %v422_v21, %v503_v1  ;;  %v186_v33 = vsub.f32 %v412_v19, %v499_v59 }
  0x27   :  { %vm168_vm4 = vweird.f32 %v140_v38  ;;  %vm178_vm7 = vweird.f32 %v141_v39  ;;  %v195_v59 = vsub.f32 %v445_v28, %v505_v4 }
  0x28   :  { %318 = vrsqrt.f32 %v138_v36  ;;  %vm148_vm0 = vweird.f32 %v138_v36  ;;  %vm158_vm2 = vweird.f32 %v139_v37 }
  0x29   :  { %320 = vrsqrt.f32 %v139_v37 }
  0x2a   :  { %322 = vrsqrt.f32 %v140_v38 }
  0x2b   :  { %324 = vrsqrt.f32 %v141_v39 }
  0x2e   :  { %v319_v41 = vpop.eup %318 }
  0x2f   :  { %v321_v42 = vpop.eup %320  ;;  %v143_v45 = vmul.f32 %v319_v41, %v138_v36  ;;  %vm149_vm1 = vweird.f32 %v319_v41 }
  0x30   :  { %v323_v43 = vpop.eup %322  ;;  %v153_v46 = vmul.f32 %v321_v42, %v139_v37  ;;  %vm159_vm3 = vweird.f32 %v321_v42  ;;  %vm150_vm6 = vmor %vm148_vm0, %vm149_vm1 }
  0x31   :  { %v325_v44 = vpop.eup %324  ;;  %v163_v47 = vmul.f32 %v323_v43, %v140_v38  ;;  %v144_v49 = vmul.f32 %v319_v41, %v143_v45  ;;  %vm169_vm5 = vweird.f32 %v323_v43  ;;  %vm160_vm9 = vmor %vm158_vm2, %vm159_vm3  ;;  %v189_v45 = vsub.f32 %v462_v34, %v501_v62 }
  0x32   :  { %v173_v48 = vmul.f32 %v325_v44, %v141_v39  ;;  %v154_v50 = vmul.f32 %v321_v42, %v153_v46  ;;  %vm179_vm8 = vweird.f32 %v325_v44  ;;  %vm170_vm10 = vmor %vm168_vm4, %vm169_vm5  ;;  %v196_v46 = vsub.f32 %v467_v35, %v503_v1 }
  0x33   :  { %v164_v51 = vmul.f32 %v323_v43, %v163_v47  ;;  %v145_v53 = vmul.f32 0.5, %v144_v49  ;;  %vm180_vm11 = vmor %vm178_vm7, %vm179_vm8  ;;  %v197_v49 = vsub.f32 %v479_v40, %v505_v4  ;;  %v187_v35 = vsub.f32 %v417_v20, %v501_v62 }
  0x34   :  { %v174_v52 = vmul.f32 %v325_v44, %v173_v48  ;;  %v155_v54 = vmul.f32 0.5, %v154_v50 }
  0x35   :  { %v165_v55 = vmul.f32 0.5, %v164_v51  ;;  %v146_v57 = vsub.f32 1.5, %v145_v53 }
  0x36   :  { %v175_v56 = vmul.f32 0.5, %v174_v52  ;;  %v156_v58 = vsub.f32 1.5, %v155_v54 }
  0x37   :  { %v166_v60 = vsub.f32 1.5, %v165_v55  ;;  %v147_v63 = vmul.f32 %v319_v41, %v146_v57 }
  0x38   :  { %v176_v61 = vsub.f32 1.5, %v175_v56  ;;  %v157_v0 = vmul.f32 %v321_v42, %v156_v58  ;;  %v194_v56 = vsub.f32 %v440_v27, %v503_v1 }
  0x39   :  { %v167_v2 = vmul.f32 %v323_v43, %v166_v60  ;;  %v151_v15 = vsel %vm150_vm6, %v319_v41, %v147_v63 }
  0x3a   :  { %v177_v3 = vmul.f32 %v325_v44, %v176_v61  ;;  %v161_v22 = vsel %vm160_vm9, %v321_v42, %v157_v0  ;;  %v198_v18 = vmul.f32 %v182_v5, %v151_v15  ;;  %v200_v11 = vmul.f32 %v184_v13, %v151_v15 }
  0x3b   :  { %v171_v16 = vsel %vm170_vm10, %v323_v43, %v167_v2  ;;  %v199_v23 = vmul.f32 %v183_v6, %v161_v22  ;;  %v201_v12 = vmul.f32 %v185_v14, %v161_v22  ;;  %v204_v54 = vmul.f32 %v188_v26, %v151_v15 }
  0x3c   :  { %v523_v17 = vsel %vm180_vm11, %v325_v44, %v177_v3  ;;  %v206_v24 = vmul.f32 %v190_v7, %v171_v16  ;;  %v208_v44 = vmul.f32 %v192_v30, %v171_v16  ;;  %v205_v55 = vmul.f32 %v189_v45, %v161_v22 }
  0x3d   :  { %v207_v25 = vmul.f32 %v191_v8, %v523_v17  ;;  %v209_v21 = vmul.f32 %v193_v31, %v523_v17  ;;  %v212_v40 = vmul.f32 %v196_v46, %v171_v16  ;;  %v213_v19 = vmul.f32 %v197_v49, %v523_v17 }
  0x3e   :  { %v202_v63 = vmul.f32 %v186_v33, %v151_v15  ;;  %v203_v20 = vmul.f32 %v187_v35, %v161_v22  ;;  %v210_v0 = vmul.f32 %v194_v56, %v171_v16  ;;  %v211_v3 = vmul.f32 %v195_v59, %v523_v17 }
  0x5e   :  { %v261_v9 = vpop.permute.xlu2 %260 }
  0x66   :  { %v266_v53 = vpop.permute.xlu2 %265 }
  0x74   :  { %v526_v29 = vpop.permute.xlu1 %230  ;;  %v221_v10 = vpop.permute.xlu0 %220 }
  0x75   :  { %v238_v32 = vmul.f32 %v221_v10, %v198_v18  ;;  %v239_v36 = vmul.f32 %v221_v10, %v199_v23  ;;  %v246_v37 = vmul.f32 %v221_v10, %v206_v24  ;;  %v247_v38 = vmul.f32 %v221_v10, %v207_v25 }
  0x76   :  { %v242_v8 = vmul.f32 %v526_v29, %v202_v63  ;;  %v243_v22 = vmul.f32 %v526_v29, %v203_v20  ;;  %v250_v16 = vmul.f32 %v526_v29, %v210_v0  ;;  %v251_v17 = vmul.f32 %v526_v29, %v211_v3 }
  0x77   :  { %v278_v39 = vadd.f32 %v261_v9, %v238_v32  ;;  %v279_v41 = vadd.f32 %v261_v9, %v239_v36  ;;  %v286_v42 = vadd.f32 %v261_v9, %v246_v37  ;;  %v287_v43 = vadd.f32 %v261_v9, %v247_v38 }
  0x79   :  { %294 = vst [vmem:[%s610_s3] sm:$0xff] %v278_v39 }
  0x7a   :  { %295 = vst [vmem:[%s610_s3 + $0x8] sm:$0xff] %v279_v41 }
  0x7b   :  { %302 = vst [vmem:[%s610_s3 + $0x40] sm:$0xff] %v286_v42 }
  0x7c   :  { %303 = vst [vmem:[%s610_s3 + $0x48] sm:$0xff] %v287_v43  ;;  %v236_v47 = vpop.permute.xlu1 %235  ;;  %v226_v48 = vpop.permute.xlu0 %225 }
  0x7d   :  { %v240_v34 = vmul.f32 %v226_v48, %v200_v11  ;;  %v241_v50 = vmul.f32 %v226_v48, %v201_v12  ;;  %v248_v51 = vmul.f32 %v226_v48, %v208_v44  ;;  %v249_v52 = vmul.f32 %v226_v48, %v209_v21 }
  0x7e   :  { %v244_v27 = vmul.f32 %v236_v47, %v204_v54  ;;  %v245_v62 = vmul.f32 %v236_v47, %v205_v55  ;;  %v252_v1 = vmul.f32 %v236_v47, %v212_v40  ;;  %v253_v4 = vmul.f32 %v236_v47, %v213_v19 }
  0x7f   :  { %v280_v57 = vadd.f32 %v266_v53, %v240_v34  ;;  %v281_v58 = vadd.f32 %v266_v53, %v241_v50  ;;  %v288_v60 = vadd.f32 %v266_v53, %v248_v51  ;;  %v289_v61 = vadd.f32 %v266_v53, %v249_v52 }
  0x81   :  { %296 = vst [vmem:[%s610_s3 + $0x10] sm:$0xff] %v280_v57 }
  0x82   :  { %297 = vst [vmem:[%s610_s3 + $0x18] sm:$0xff] %v281_v58 }
  0x83   :  { %304 = vst [vmem:[%s610_s3 + $0x50] sm:$0xff] %v288_v60 }
  0x84   :  { %305 = vst [vmem:[%s610_s3 + $0x58] sm:$0xff] %v289_v61  ;;  %v276_v28 = vpop.permute.xlu1 %275  ;;  %v271_v2 = vpop.permute.xlu0 %270 }
  0x85   :  { %v284_v5 = vadd.f32 %v276_v28, %v244_v27  ;;  %v285_v6 = vadd.f32 %v276_v28, %v245_v62  ;;  %v292_v7 = vadd.f32 %v276_v28, %v252_v1  ;;  %v293_v15 = vadd.f32 %v276_v28, %v253_v4 }
  0x86   :  { %v282_v18 = vadd.f32 %v271_v2, %v242_v8  ;;  %v283_v23 = vadd.f32 %v271_v2, %v243_v22  ;;  %v290_v24 = vadd.f32 %v271_v2, %v250_v16  ;;  %v291_v25 = vadd.f32 %v271_v2, %v251_v17 }
  0x87   :  { %300 = vst [vmem:[%s610_s3 + $0x30] sm:$0xff] %v284_v5 }
  0x88   :  { %301 = vst [vmem:[%s610_s3 + $0x38] sm:$0xff] %v285_v6 }
  0x89   :  { %308 = vst [vmem:[%s610_s3 + $0x70] sm:$0xff] %v292_v7 }
  0x8a   :  { %309 = vst [vmem:[%s610_s3 + $0x78] sm:$0xff] %v293_v15 }
  0x8b   :  { %298 = vst [vmem:[%s610_s3 + $0x20] sm:$0xff] %v282_v18 }
  0x8c   :  { %299 = vst [vmem:[%s610_s3 + $0x28] sm:$0xff] %v283_v23 }
  0x8d   :  { %306 = vst [vmem:[%s610_s3 + $0x60] sm:$0xff] %v290_v24 }
  0x8e   :  { %307 = vst [vmem:[%s610_s3 + $0x68] sm:$0xff] %v291_v25 }

</bundles_post_ra>
